<compile_context>
chip_gen: v5e
topology: v5e:2x2
jax: 0.10.0
libtpu: 0.0.40
codegen_flags: <defaults>
</compile_context>

<pallas_src>
import functools
import math

import jax
import jax.numpy as jnp
from jax.experimental import pallas as pl
from jax.experimental.pallas import tpu as pltpu


_NEG_FILL = -1e30   # large finite negative: exp() underflows to exactly 0, no 0*(-inf)=NaN
_NUM_SHARDS = 2     # v7x has 2 TensorCores; on v5e/v6e this is just an outer sequential loop


def _threshold_entropy_kernel(prob_ref, label_ref, out_ref, *,
                              beta, threshold, block_n, steps_per_shard, n_valid):
    c = pl.program_id(0)          # shard axis ("parallel": split across TCs on v7x)
    i = pl.program_id(1)          # reduction axis ("arbitrary")

    x = prob_ref[...].astype(jnp.float32)                 # (block_n, C_pad)

    # log-softmax pieces with a single full-tile exp sweep (EUP), reused for both
    # the normalizer and the entropy term.
    m = jnp.max(x, axis=1, keepdims=True)                  # (block_n, 1)
    z = x - m
    ez = jnp.exp(z)                                        # only EUP pass over the tile
    s = jnp.sum(ez, axis=1, keepdims=True)                 # (block_n, 1)
    logs = jnp.log(s)

    # entropy = -sum(p * log p) = log(s) - sum(ez * z) / s  (no second exp, no p tensor)
    szz = jnp.sum(ez * z, axis=1, keepdims=True)
    entropy = logs - szz / s
    ent = threshold - entropy
    masked_ent = jnp.maximum(ent, 0.0)                     # == ent * (ent > 0)

    # NLL: -log_softmax(x)[n, label[n]] = log(s) - z[n, label[n]]  (one-hot select, no gather)
    row0 = (c * steps_per_shard + i) * block_n
    row0 = pl.multiple_of(row0, block_n)
    labels = label_ref[pl.ds(row0, block_n), :]            # (block_n, 1) int32, resident in VMEM
    lane = jax.lax.broadcasted_iota(jnp.int32, x.shape, 1)
    onehot = (lane == labels).astype(jnp.float32)
    z_lab = jnp.sum(z * onehot, axis=1, keepdims=True)
    nll = logs - z_lab

    # mask out rows added only for padding
    row_idx = row0 + jax.lax.broadcasted_iota(jnp.int32, (block_n, 1), 0)
    valid = (row_idx < n_valid).astype(jnp.float32)

    # raw (unscaled) partial sum; /N is hoisted to the wrapper
    partial = jnp.sum((nll - beta * masked_ent) * valid)

    @pl.when(i == 0)
    def _():
        out_ref[...] = jnp.zeros_like(out_ref)

    out_ref[...] += partial


def threshold_entropy_loss(prob, label, *, beta=0.1, threshold=0.5, block_n=None):
    N, C = prob.shape
    c_pad = max(128, ((C + 127) // 128) * 128)             # lane-dense class axis

    if block_n is None:
        # largest row tile such that one prob buffer stays around <= 4 MiB
        cap = max(8, min(1024, (4 * 1024 * 1024) // (c_pad * 4)))
        cap = (cap // 8) * 8
        rows_per_shard = math.ceil(N / _NUM_SHARDS)
        block_n = min(cap, ((rows_per_shard + 7) // 8) * 8)
    assert block_n % 8 == 0

    steps = math.ceil(math.ceil(N / _NUM_SHARDS) / block_n)
    n_pad = _NUM_SHARDS * steps * block_n

    # Pad rows/classes. Padded entries get a large finite negative so softmax,
    # entropy and the one-hot select are unaffected (and no NaNs appear).
    fill = jnp.asarray(_NEG_FILL, dtype=prob.dtype)
    prob_p = jnp.full((n_pad, c_pad), fill, dtype=prob.dtype)
    prob_p = prob_p.at[:N, :C].set(prob)
    label_p = jnp.zeros((n_pad, 1), dtype=jnp.int32)
    label_p = label_p.at[:N, 0].set(label.astype(jnp.int32))

    kernel = functools.partial(
        _threshold_entropy_kernel,
        beta=float(beta),
        threshold=float(threshold),
        block_n=block_n,
        steps_per_shard=steps,
        n_valid=N,
    )

    out = pl.pallas_call(
        kernel,
        out_shape=jax.ShapeDtypeStruct((_NUM_SHARDS * 8, 128), jnp.float32),
        grid_spec=pltpu.PrefetchScalarGridSpec(
            num_scalar_prefetch=0,
            grid=(_NUM_SHARDS, steps),
            in_specs=[
                # prob: streamed lane-dense tiles
                pl.BlockSpec((block_n, c_pad), lambda c, i: (c * steps + i, 0)),
                # labels: fully resident (constant block index -> fetched once)
                pl.BlockSpec((n_pad, 1), lambda c, i: (0, 0)),
            ],
            # one (8,128) accumulator block per shard; revisited only along the
            # "arbitrary" reduction axis
            out_specs=pl.BlockSpec((8, 128), lambda c, i: (c, 0)),
        ),
        compiler_params=pltpu.CompilerParams(
            dimension_semantics=("parallel", "arbitrary"),
            vmem_limit_bytes=48 * 1024 * 1024,
        ),
    )(prob_p, label_p)

    shard_sums = out.reshape(_NUM_SHARDS, 8, 128)[:, 0, 0]
    return jnp.sum(shard_sums) / jnp.float32(N)


def _reference(prob, label, beta=0.1, threshold=0.5):
    lp = jax.nn.log_softmax(prob.astype(jnp.float32), axis=1)
    entropy = -jnp.sum(jnp.exp(lp) * lp, axis=1, keepdims=True)
    ent = threshold - entropy
    mask = (ent > 0).astype(jnp.float32)
    nll = -jnp.take_along_axis(lp, label.reshape(-1, 1), axis=1)[:, 0]
    # exact PyTorch broadcasting: (N,) - (N,1) -> (N,N), then mean
    return jnp.mean(nll[None, :] - beta * ent * mask)


if __name__ == "__main__":
    key = jax.random.PRNGKey(0)
    k1, k2 = jax.random.split(key)

    N, C = 8, 32
    prob = jax.random.normal(k1, (N, C), dtype=jnp.float32)
    label = jax.random.randint(k2, (N,), 0, C, dtype=jnp.int32)

    loss = threshold_entropy_loss(prob, label, beta=0.1, threshold=0.5)
    loss = jax.block_until_ready(loss)

    ref = _reference(prob, label, beta=0.1, threshold=0.5)
    assert jnp.allclose(loss, ref, atol=1e-5, rtol=1e-5), (loss, ref)

    print("KERNEL_OK")
</pallas_src>

<mosaic_0001>
module attributes {stable_mosaic.version = 11 : i64} {
  func.func @_threshold_entropy_kernel(%arg0: i32, %arg1: i32, %arg2: memref<8x128xf32, #tpu.memory_space<vmem>>, %arg3: memref<16x1xi32, #tpu.memory_space<vmem>>, %arg4: memref<8x128xf32, #tpu.memory_space<vmem>>) attributes {dimension_semantics = [#tpu.dimension_semantics<parallel>, #tpu.dimension_semantics<arbitrary>], iteration_bounds = array<i64: 2, 1>, scalar_prefetch = 0 : i64, scratch_operands = 0 : i64, tpu.core_type = #tpu.core_type<tc>, window_params = [{transform_indices = @transform_0, window_bounds = array<i64: 8, 128>}, {pipeline_mode = #tpu.pipeline_mode<synchronous>, transform_indices = @transform_1, window_bounds = array<i64: 16, 1>}, {transform_indices = @transform_2, window_bounds = array<i64: 8, 128>}]} {
    %c0 = arith.constant 0 : index
    %c0_0 = arith.constant 0 : index
    %0 = vector.load %arg2[%c0, %c0_0] : memref<8x128xf32, #tpu.memory_space<vmem>>, vector<8x128xf32>
    %cst = arith.constant dense<0xFF800000> : vector<8xf32>
    %1 = vector.multi_reduction <maximumf>, %0, %cst [1] : vector<8x128xf32> to vector<8xf32>
    %2 = vector.shape_cast %1 : vector<8xf32> to vector<8x1xf32>
    %3 = vector.broadcast %2 : vector<8x1xf32> to vector<8x128xf32>
    %4 = arith.subf %0, %3 : vector<8x128xf32>
    %5 = math.exp %4 : vector<8x128xf32>
    %cst_1 = arith.constant dense<0.000000e+00> : vector<8xf32>
    %6 = vector.multi_reduction <add>, %5, %cst_1 [1] : vector<8x128xf32> to vector<8xf32>
    %7 = vector.shape_cast %6 : vector<8xf32> to vector<8x1xf32>
    %8 = math.log %7 : vector<8x1xf32>
    %9 = arith.mulf %5, %4 : vector<8x128xf32>
    %cst_2 = arith.constant dense<0.000000e+00> : vector<8xf32>
    %10 = vector.multi_reduction <add>, %9, %cst_2 [1] : vector<8x128xf32> to vector<8xf32>
    %11 = vector.shape_cast %10 : vector<8xf32> to vector<8x1xf32>
    %12 = arith.divf %11, %7 : vector<8x1xf32>
    %13 = arith.subf %8, %12 : vector<8x1xf32>
    %cst_3 = arith.constant 5.000000e-01 : f32
    %14 = vector.broadcast %cst_3 : f32 to vector<8x1xf32>
    %15 = arith.subf %14, %13 : vector<8x1xf32>
    %cst_4 = arith.constant 0.000000e+00 : f32
    %16 = vector.broadcast %cst_4 : f32 to vector<8x1xf32>
    %17 = arith.maximumf %15, %16 : vector<8x1xf32>
    %c1_i32 = arith.constant 1 : i32
    %18 = arith.muli %arg0, %c1_i32 : i32
    %19 = arith.addi %18, %arg1 : i32
    %c8_i32 = arith.constant 8 : i32
    %20 = arith.muli %19, %c8_i32 : i32
    %21 = tpu.assume_multiple %20, 8 : i32
    %22 = arith.index_cast %21 : i32 to index
    %c0_5 = arith.constant 0 : index
    %23 = vector.load %arg3[%22, %c0_5] : memref<16x1xi32, #tpu.memory_space<vmem>>, vector<8x1xi32>
    %24 = tpu.iota {dimensions = array<i32: 1>} : vector<8x128xi32>
    %25 = vector.broadcast %23 : vector<8x1xi32> to vector<8x128xi32>
    %26 = arith.cmpi eq, %24, %25 : vector<8x128xi32>
    %27 = arith.extui %26 : vector<8x128xi1> to vector<8x128xi32>
    %28 = arith.sitofp %27 : vector<8x128xi32> to vector<8x128xf32>
    %29 = arith.mulf %4, %28 : vector<8x128xf32>
    %cst_6 = arith.constant dense<0.000000e+00> : vector<8xf32>
    %30 = vector.multi_reduction <add>, %29, %cst_6 [1] : vector<8x128xf32> to vector<8xf32>
    %31 = vector.shape_cast %30 : vector<8xf32> to vector<8x1xf32>
    %32 = arith.subf %8, %31 : vector<8x1xf32>
    %33 = tpu.iota {dimensions = array<i32: 0>} : vector<8x1xi32>
    %34 = vector.broadcast %21 : i32 to vector<8x1xi32>
    %35 = arith.addi %34, %33 : vector<8x1xi32>
    %c8_i32_7 = arith.constant 8 : i32
    %36 = vector.broadcast %c8_i32_7 : i32 to vector<8x1xi32>
    %37 = arith.cmpi slt, %35, %36 : vector<8x1xi32>
    %38 = arith.extui %37 : vector<8x1xi1> to vector<8x1xi32>
    %39 = arith.sitofp %38 : vector<8x1xi32> to vector<8x1xf32>
    %cst_8 = arith.constant 1.000000e-01 : f32
    %40 = vector.broadcast %cst_8 : f32 to vector<8x1xf32>
    %41 = arith.mulf %40, %17 : vector<8x1xf32>
    %42 = arith.subf %32, %41 : vector<8x1xf32>
    %43 = arith.mulf %42, %39 : vector<8x1xf32>
    %44 = vector.shape_cast %43 : vector<8x1xf32> to vector<1x8x1xf32>
    %cst_9 = arith.constant dense<0.000000e+00> : vector<1xf32>
    %45 = vector.multi_reduction <add>, %44, %cst_9 [1, 2] : vector<1x8x1xf32> to vector<1xf32>
    %46 = vector.shape_cast %45 : vector<1xf32> to vector<1x1x1xf32>
    %47 = vector.extract %46[0, 0, 0] : f32 from vector<1x1x1xf32>
    %c0_i32 = arith.constant 0 : i32
    %48 = arith.cmpi eq, %arg1, %c0_i32 : i32
    %49 = arith.extui %48 : i1 to i32
    %c0_i32_10 = arith.constant 0 : i32
    %50 = arith.cmpi ne, %49, %c0_i32_10 : i32
    scf.if %50 {
      %cst_15 = arith.constant 0.000000e+00 : f32
      %55 = vector.broadcast %cst_15 : f32 to vector<8x128xf32>
      %c0_16 = arith.constant 0 : index
      %c0_17 = arith.constant 0 : index
      %56 = vector.load %arg4[%c0_16, %c0_17] : memref<8x128xf32, #tpu.memory_space<vmem>>, vector<8x128xf32>
      tpu.vector_store %arg4[%c0_16, %c0_17], %55 {strides = array<i32>} : memref<8x128xf32, #tpu.memory_space<vmem>>, vector<8x128xf32>,
    } else {
    }
    %c0_11 = arith.constant 0 : index
    %c0_12 = arith.constant 0 : index
    %51 = vector.load %arg4[%c0_11, %c0_12] : memref<8x128xf32, #tpu.memory_space<vmem>>, vector<8x128xf32>
    %52 = vector.broadcast %47 : f32 to vector<8x128xf32>
    %53 = arith.addf %51, %52 : vector<8x128xf32>
    %c0_13 = arith.constant 0 : index
    %c0_14 = arith.constant 0 : index
    %54 = vector.load %arg4[%c0_13, %c0_14] : memref<8x128xf32, #tpu.memory_space<vmem>>, vector<8x128xf32>
    tpu.vector_store %arg4[%c0_13, %c0_14], %53 {strides = array<i32>} : memref<8x128xf32, #tpu.memory_space<vmem>>, vector<8x128xf32>,
    return
  }
  func.func @transform_0(%arg0: i32, %arg1: i32) -> (i32, i32) {
    %c1_i32 = arith.constant 1 : i32
    %0 = arith.muli %arg0, %c1_i32 : i32
    %1 = arith.addi %0, %arg1 : i32
    %c0_i32 = arith.constant 0 : i32
    %c0_i32_0 = arith.constant 0 : i32
    return %1, %c0_i32 : i32, i32
  }
  func.func @transform_1(%arg0: i32, %arg1: i32) -> (i32, i32) {
    %c0_i32 = arith.constant 0 : i32
    %c0_i32_0 = arith.constant 0 : i32
    %c0_i32_1 = arith.constant 0 : i32
    return %c0_i32, %c0_i32_0 : i32, i32
  }
  func.func @transform_2(%arg0: i32, %arg1: i32) -> (i32, i32) {
    %c0_i32 = arith.constant 0 : i32
    %c0_i32_0 = arith.constant 0 : i32
    return %arg0, %c0_i32 : i32, i32
  }
}

</mosaic_0001>

<bundles_post_ra>
// kernel: tpu_custom_call.1
= control target key start
LH: loop header
LB: loop body
LE: loop exit
PB: predicated region body
PF: predicated region fallthrough
CT: control target
= control target key end

     0   :  { %7 = vsyncpa [#allocation3], 0  ;;  %s598_s0 = inlined_call_operand.vmem [shape: f32[16,128], index: 0, kind: input, shape index: {}]   ;;  %s599_s1 = inlined_call_operand.vmem [shape: s32[16,1], index: 1, kind: input, shape index: {}]   ;;  %s600_s2 = inlined_call_operand.hbm [shape: f32[16,128], index: 2, kind: output, shape index: {}]  }
   0x1   :  { %9 = vsyncpa [#allocation3 + $0x1], 0  ;;  %s498_s9 = smov 0   ;;  %s500_s10 = smov 0  }
   0x2   :  { %s502_s11 = smov 0   ;;  %s504_s12 = smov 0  }
   0x3   :  { %s506_s13 = smov 0   ;;  %s508_s14 = smov 0  }
   0x4 LB: > { %s321_s15 = sadd.s32 4294967295, %s479_s14   ;;  %s322_s16 = sadd.s32 4294967294, %s479_s14   ;;  %s479_s14 = sphi %s508_s14, %s15_s14   ;;  %s475_s13 = sphi %s506_s13, %s607_s13   ;;  %s471_s12 = sphi %s504_s12, %s606_s12   ;;  %s467_s11 = sphi %s502_s11, %s605_s11   ;;  %s463_s10 = sphi %s500_s10, %s604_s10   ;;  %s459_s9 = sphi %s498_s9, %s603_s9  }
   0x5   : > { %s27_s17 = sadd.s32 1, %s475_s13  ;;  %s83_s18 = sadd.s32 1, %s467_s11 }
   0x6   : > { %p29_p0 = scmp.ge.s32.totalorder %s27_s17, 2  ;;  %p93_p1 = scmp.ne.s32.totalorder %s467_s11, %s463_s10 }
   0x7   : > { %p94_p2 = scmp.eq.s32.totalorder %s321_s15, 1  ;;  %p99_p3 = scmp.ne.s32.totalorder %s463_s10, %s459_s9 }
   0x8   : > { %s609_s17 = smov (%p29_p0, %s27_s17), 0  ;;  %p100_p5 = scmp.eq.s32.totalorder %s322_s16, 1 }
   0x9   : > { %p536_p4 = por %p94_p2, %p93_p1  ;;  %s80_s20 = ssub.s32 %s475_s13, %s609_s17 }
   0xa   : > { %p325_p6 = scmp.ge.s32.totalorder %s479_s14, 1  ;;  %p81_p7 = scmp.eq.s32.totalorder %s80_s20, 0 }
   0xb   : > { %p543_p8 = por %p100_p5, %p99_p3  ;;  %p130_p9 = scmp.lt.s32.totalorder %s479_s14, 3 }
   0xc   : > { %s549_s22 = scalar_select %p81_p7, %s467_s11, %s83_s18  }
   0xd   : > { %p131_p10 = pnand %p325_p6, %p130_p9 }
   0xe   : > { %p153_p11 = scmp.lt.s32.totalorder (!%p131_p10), %s471_s12, 1  ;;  %s554_s28 = sshll.u32 (!%p131_p10), %s471_s12, 3 }
   0xf   : > { %134 = sbr.rel (%p131_p10) target bundleno = 482 (0x1e2), region = 28  ;;  %s191_s3 = scalar_lea.vmem (!%p131_p10), %s599_s1, %s554_s28 }
  0x10   : > { %s149_s4 = sand.u32 (!%p131_p10), 1, %s463_s10   ;;  %s246_s8 = scalar_lea.hbm (!%p131_p10), %s600_s2, %s554_s28 }
  0x11   : > { %s326_s5 = sshll.u32 (!%p131_p10), %s149_s4, 3  ;;  %s250_s16 = sshll.u32 (!%p131_p10), %s246_s8, 4  ;;  %s251_s16 = int_to_ptr.hbm [resolvable:$true] %s250_s16 }
  0x12   : > { %s236_s20 = scalar_lea.sflag (!%p131_p10), [#allocation3], %s149_s4 }
  0x14   : > { %v481_v0 = vmov 0   ;;  %s154_s23 = scalar_select %p153_p11, %s471_s12, 1  ;;  %v192_v2 = vld [vmem:[%s191_s3] sm:$0xff]  ;;  %v193_v7 = vlaneseq  ;;  %v482_v11 = vmov 0.0   ;;  %v207_v28 = vstv %s554_s28 }
  0x15   : > { %394 = vset.pattern.permute.xlu0 %v481_v0  ;;  %vm215_vm6 = vcmask 7168   ;;  %s151_s12 = scalar_lea.vmem [#allocation2], %s326_s5 }
  0x16   : > { %s327_s24 = sshll.u32 %s154_s23, 3  ;;  %v194_v8 = vand.u32 127, %v193_v7  ;;  %v206_v24 = vshrl.u32 %v193_v7, 7  ;;  %s248_s15 = sshll.u32 %s151_s12, 4  ;;  %s249_s15 = int_to_ptr.vmem [resolvable:$true] %s248_s15 }
  0x17   : > { %s156_s27 = scalar_lea.vmem %s598_s0, %s327_s24  ;;  %s415_s23 = sshra.s32 %s251_s16, 4  ;;  %s416_s23 = int_to_ptr.hbm [resolvable:$true] %s415_s23 }
  0x18   : > { %v158_v1 = vld [vmem:[%s156_s27] sm:$0xff]  ;;  %v208_v32 = vadd.s32 %v207_v28, %v206_v24  ;;  %s417_s24 = scalar_lea.hbm %s416_s23, 8  ;;  %s421_s27 = scalar_lea.hbm %s600_s2, 16 }
  0x19   : > { %159 = vmax.xlane.f32.xlu0 %v158_v1  ;;  %p418_p12 = scmp.ne.s32.totalorder %s416_s23, %s417_s24  ;;  %p422_p1 = scmp.lt.s32.totalorder %s416_s23, %s600_s2 }
  0x1a   : > { %vm209_vm5 = vcmp.lt.s32.totalorder %v208_v32, 8  ;;  %p423_p2 = scmp.lt.s32.totalorder %s421_s27, %s417_s24 }
  0x1b   : > { %v330_v38 = vsel %vm209_vm5, 1.0, %v482_v11  ;;  %p419_p13 = pnand %p418_p12, %p536_p4 }
  0x1c   : > { %p424_p3 = por %p423_p2, %p422_p1 }
  0x1d   : > { %p420_p0 = pneg %p419_p13 }
  0x1f   : > { %p425_p5 = pnand %p424_p3, %p420_p0 }
  0x2d   : > { %196 = vperm.xlu0 %394, %v192_v2  }
  0x8c   : > { %v160_v3 = vpop.xlane.xlu0 %159 }
  0x8d   : > { %v161_v4 = vsub.f32 %v158_v1, %v160_v3 }
  0x8f   : > { %v162_v5 = vmul.f32 1.442695, %v161_v4 }
  0x91   : > { %395 = vpow2.f32 %v162_v5 }
  0x97   : > { %v396_v6 = vpop.eup %395 }
  0x98   : > { %164 = vadd.xlane.f32.xlu1 %v396_v6  ;;  %v168_v9 = vmul.f32 %v396_v6, %v161_v4 }
  0x9f   : > { %v197_v10 = vpop.permute.xlu0 %196 }
  0xa0   : > { %vm198_vm0 = vcmp.eq.s32.totalorder %v194_v8, %v197_v10  ;;  %169 = vadd.xlane.f32.xlu1 %v168_v9 }
  0xa1   : > { %v329_v12 = vsel %vm198_vm0, 1.0, %v482_v11 }
  0xa2   : > { %v201_v13 = vmul.f32 %v329_v12, %v161_v4 }
  0xa4   : > { %202 = vadd.xlane.f32.xlu2 %v201_v13 }
 0x10b   : > { %v165_v14 = vpop.xlane.xlu1 %164 }
 0x10c   : > { %397 = vrcp.f32 %v165_v14  ;;  %v182_v18 = vand.u32 2147483648, %v165_v14  ;;  %v180_v20 = vand.u32 2147483647, %v165_v14  ;;  %vm176_vm2 = vweird.f32 %v165_v14 }
 0x10d   : > { %399 = vlog2.f32 %v165_v14 }
 0x10e   : > { %v183_v23 = vor.u32 1.1754944e-38, %v182_v18  ;;  %vm181_vm4 = vcmp.eq.f32.partialorder %v180_v20, 8.507059e+37 }
 0x112   : > { %v398_v15 = vpop.eup %397 }
 0x113   : > { %v172_v16 = vmul.f32 %v398_v15, %v165_v14  ;;  %vm177_vm1 = vweird.f32 %v398_v15  ;;  %v400_v22 = vpop.eup %399  ;;  %v170_v27 = vpop.xlane.xlu1 %169 }
 0x114   : > { %vm178_vm3 = vmor %vm176_vm2, %vm177_vm1  ;;  %v167_v29 = vmul.f32 0.6931472, %v400_v22 }
 0x115   : > { %v173_v17 = vsub.f32 1.0, %v172_v16 }
 0x117   : > { %v174_v19 = vmul.f32 %v398_v15, %v173_v17  ;;  %v203_v34 = vpop.xlane.xlu2 %202 }
 0x118   : > { %v204_v37 = vsub.f32 %v167_v29, %v203_v34 }
 0x119   : > { %v175_v21 = vadd.f32 %v398_v15, %v174_v19 }
 0x11b   : > { %v179_v25 = vsel %vm178_vm3, %v398_v15, %v175_v21 }
 0x11c   : > { %v184_v26 = vsel %vm181_vm4, %v183_v23, %v179_v25 }
 0x11d   : > { %v185_v30 = vmul.f32 %v184_v26, %v170_v27 }
 0x11f   : > { %v186_v31 = vsub.f32 %v167_v29, %v185_v30 }
 0x121   : > { %v187_v33 = vsub.f32 0.5, %v186_v31 }
 0x123   : > { %v188_v35 = vmax.f32 %v187_v33, 0.0 }
 0x125   : > { %v212_v36 = vmul.f32 0.1, %v188_v35 }
 0x127   : > { %v213_v39 = vsub.f32 %v204_v37, %v212_v36 }
 0x129   : > { %v214_v40 = vmul.f32 %v330_v38, %v213_v39 }
 0x12b   : > { %v216_v41 = vsel %vm215_vm6, %v214_v40, 0.0 }
 0x12c   : > { %217 = vadd.xlane.f32.xlu2 %v216_v41 }
 0x19f   : > { %v218_v42 = vpop.xlane.xlu2 %217 }
 0x1a0   : > { %v219_v43 = vrot.slane %v218_v42, 4 }
 0x1a2   : > { %v220_v44 = vadd.f32 %v219_v43, %v218_v42 }
 0x1a4   : > { %v221_v45 = vrot.slane %v220_v44, 2 }
 0x1a6   : > { %v222_v46 = vadd.f32 %v221_v45, %v220_v44 }
 0x1a8   : > { %v223_v47 = vrot.slane %v222_v46, 1 }
 0x1aa   : > { %v224_v48 = vadd.f32 %v223_v47, %v222_v46 }
 0x1ac   : > { %335 = vpush %v224_v48 }
 0x1dd   : > { %s336_s18 = spop %335 }
 0x1de   : > { %v232_v49 = vstv %s336_s18 }
 0x1df   : > { %234 = vst [vmem:[%s151_s12] sm:$0xff] %v232_v49 }
 0x1e0   : > { %428 = shalt.err (!%p425_p5)
}
 0x1e1   : > { %337 = dma.vmem_to_hbm [thread:$0]  (%p536_p4), %s249_s15, 128, %s251_s16, %s236_s20  }
 0x1e2 PF: > { %p343_p6 = scmp.ge.s32.totalorder %s479_s14, 2  ;;  %s262_s30 = sand.u32 1, %s459_s9  }
 0x1e3   : > { %s263_s3 = scalar_lea.sflag [#allocation3], %s262_s30 }
 0x1e4   : > { %p340_p7 = pnand %p343_p6, %p543_p8 }
 0x1e6   : > { %p341_p9 = pneg %p340_p7 }
 0x1e8   : > { %454 = dma.done.wait (%p341_p9), %s263_s3, 128  }
 0x1e9   : > { %456 = vsyncadd (%p341_p9), %s263_s3, 4294967168  ;;  %s15_s14 = sadd.s32 1, %s479_s14   ;;  %s603_s9 = smov %s463_s10 }
 0x1ea   : > { %p12_p10 = scmp.ge.s32.totalorder %s15_s14, 4   ;;  %s604_s10 = smov %s467_s11 }
 0x1eb   : > { %s605_s11 = smov %s549_s22  ;;  %s606_s12 = smov %s475_s13 }
 0x1ec   : > { %s607_s13 = smov %s609_s17  ;;  %14 = sbr.rel (!%p12_p10) target bundleno = 4 (0x4), region = 68 }
 0x1f1   :  { %269 = vsyncpa [#allocation3], 1 }
 0x1f2   :  { %271 = vsyncpa [#allocation3 + $0x1], 1 }

</bundles_post_ra>
